<compile_context>
chip_gen: v7x
topology: tpu7x:2x2x1
jax: 0.10.0
libtpu: 0.0.40
codegen_flags: <defaults>
</compile_context>

<pallas_src>
import numpy as np
import jax
import jax.numpy as jnp
from jax import lax
from jax.experimental import pallas as pl
from jax.experimental.pallas import tpu as pltpu

KSIZE = 3
PAD = 1
EPS = 1e-5


# --------------------------------------------------------------------------- #
# Pallas kernel
# --------------------------------------------------------------------------- #
def _bottleneck_kernel(x_ref, s_ref, m1_ref, b1_ref, m2_ref, b2_ref,
                       m3_ref, b3_ref, out_ref):
    # x_ref  : (B*H, W*C)       input, lane-dense NHWC 2-D view
    # s_ref  : (3, B*H, B*H)    0/1 dy-shift matrices (H zero-pad baked in)
    # m1_ref : (3, W*C,  W*Ci)  ext_conv1 banded weights (BN1 scale folded)
    # b1_ref : (1, W*Ci)        BN1 shift, tiled over W
    # m2_ref : (3, W*Ci, W*Ci)  ext_conv2 banded weights (BN2 scale folded)
    # b2_ref : (1, W*Ci)        BN2 shift, tiled over W
    # m3_ref : (W*Ci, W*C)      ext_conv3 1x1 block-diag weights (BN3 scale folded)
    # b3_ref : (1, W*C)         BN3 shift, tiled over W
    # out_ref: (B*H, W*C)
    x = x_ref[...]

    def conv3x3(inp, m_ref):
        acc = None
        for t in range(KSIZE):                       # dy = t - 1 taps
            shifted = jnp.dot(s_ref[t], inp,
                              preferred_element_type=jnp.float32)
            part = jnp.dot(shifted, m_ref[t],
                           preferred_element_type=jnp.float32)
            acc = part if acc is None else acc + part
        return acc

    # ext_conv1: 3x3 conv (C -> Ci) + BN (scale folded) + ReLU
    t1 = jnp.maximum(conv3x3(x, m1_ref) + b1_ref[...], 0.0)

    # ext_conv2: 3x3 conv (Ci -> Ci) + BN + ReLU
    t2 = jnp.maximum(conv3x3(t1, m2_ref) + b2_ref[...], 0.0)

    # ext_conv3: 1x1 conv (Ci -> C) + BN + Dropout2d(p=0, identity) + ReLU
    t3 = jnp.maximum(
        jnp.dot(t2, m3_ref[...], preferred_element_type=jnp.float32)
        + b3_ref[...], 0.0)

    # residual: main (shortcut) branch + extension branch
    out_ref[...] = x + t3


# --------------------------------------------------------------------------- #
# Wrapper-side constant preparation (BN folding + shift / band matrices)
# --------------------------------------------------------------------------- #
def _prepare_operands(params, B, H, W):
    Ci, C = params['w1'].shape[0], params['w1'].shape[1]

    def fold(w, bn):
        gamma, beta, mean, var = (np.asarray(a, np.float64) for a in bn)
        scale = gamma / np.sqrt(var + EPS)
        w_f = np.asarray(w, np.float64) * scale[:, None, None, None]
        shift = beta - mean * scale
        return w_f.astype(np.float32), shift.astype(np.float32)

    w1f, sh1 = fold(params['w1'], params['bn1'])   # (Ci, C, 3, 3), (Ci,)
    w2f, sh2 = fold(params['w2'], params['bn2'])   # (Ci, Ci, 3, 3), (Ci,)
    w3f, sh3 = fold(params['w3'], params['bn3'])   # (C,  Ci, 1, 1), (C,)

    # dy-shift (+ zero padding in H, batch-boundary aware) as 0/1 matrices:
    # (S_dy @ X)[b*H+h, :] = X[b*H+h+dy, :] if 0 <= h+dy < H else 0.
    BH = B * H
    S = np.zeros((KSIZE, BH, BH), np.float32)
    for t, dy in enumerate((-1, 0, 1)):
        for r in range(BH):
            if 0 <= (r % H) + dy < H:
                S[t, r, r + dy] = 1.0

    # Banded right-matrices: fold the dx taps, W zero padding and the channel
    # contraction into one (W*Cin, W*Cout) matmul per dy tap.
    def band(wf, cin, cout):
        M = np.zeros((KSIZE, W * cin, W * cout), np.float32)
        for t, dy in enumerate((-1, 0, 1)):
            for w in range(W):
                for dx in (-1, 0, 1):
                    wp = w + dx
                    if 0 <= wp < W:
                        M[t, wp * cin:(wp + 1) * cin,
                             w * cout:(w + 1) * cout] = wf[:, :, dy + 1, dx + 1].T
        return M

    M1 = band(w1f, C, Ci)                          # (3, W*C,  W*Ci)
    M2 = band(w2f, Ci, Ci)                         # (3, W*Ci, W*Ci)

    # 1x1 expansion conv as a block-diagonal matrix.
    M3 = np.zeros((W * Ci, W * C), np.float32)
    for w in range(W):
        M3[w * Ci:(w + 1) * Ci, w * C:(w + 1) * C] = w3f[:, :, 0, 0].T

    B1 = np.tile(sh1, W).reshape(1, W * Ci)
    B2 = np.tile(sh2, W).reshape(1, W * Ci)
    B3 = np.tile(sh3, W).reshape(1, W * C)

    return tuple(jnp.asarray(a, jnp.float32) for a in (S, M1, B1, M2, B2, M3, B3))


def regular_bottleneck_pallas(x_nchw, params):
    """x_nchw: (B, C, H, W) float32. Returns (B, C, H, W) float32."""
    B, C, H, W = x_nchw.shape
    operands = _prepare_operands(params, B, H, W)

    # NCHW -> NHWC -> lane-dense (B*H, W*C) view (free reshape of contiguous NHWC).
    x2d = jnp.transpose(x_nchw, (0, 2, 3, 1)).astype(jnp.float32).reshape(B * H, W * C)

    vmem = pl.BlockSpec(memory_space=pltpu.MemorySpace.VMEM)
    out2d = pl.pallas_call(
        _bottleneck_kernel,
        out_shape=jax.ShapeDtypeStruct((B * H, W * C), jnp.float32),
        in_specs=[vmem] * 8,
        out_specs=vmem,
    )(x2d, *operands)

    return jnp.transpose(out2d.reshape(B, H, W, C), (0, 3, 1, 2))


# --------------------------------------------------------------------------- #
# Pure-JAX reference (NCHW, mirrors the PyTorch module in inference mode)
# --------------------------------------------------------------------------- #
def regular_bottleneck_ref(x, params):
    def conv(y, w, pad):
        return lax.conv_general_dilated(
            y, w, window_strides=(1, 1), padding=[(pad, pad), (pad, pad)],
            dimension_numbers=('NCHW', 'OIHW', 'NCHW'))

    def bn(y, gamma, beta, mean, var):
        s = gamma / jnp.sqrt(var + EPS)
        return y * s[None, :, None, None] + (beta - mean * s)[None, :, None, None]

    e = jax.nn.relu(bn(conv(x, params['w1'], PAD), *params['bn1']))
    e = jax.nn.relu(bn(conv(e, params['w2'], PAD), *params['bn2']))
    e = jax.nn.relu(bn(conv(e, params['w3'], 0), *params['bn3']))
    return x + e


def make_params(key, channels, internal_channels):
    ks = jax.random.split(key, 16)
    C, Ci = channels, internal_channels

    def bn_params(k, n):
        k1, k2, k3, k4 = jax.random.split(k, 4)
        gamma = jax.random.uniform(k1, (n,), jnp.float32, 0.5, 1.5)
        beta = jax.random.normal(k2, (n,), jnp.float32) * 0.1
        mean = jax.random.normal(k3, (n,), jnp.float32) * 0.1
        var = jax.random.uniform(k4, (n,), jnp.float32, 0.5, 1.5)
        return (gamma, beta, mean, var)

    return {
        'w1': jax.random.normal(ks[0], (Ci, C, KSIZE, KSIZE), jnp.float32) * 0.1,
        'w2': jax.random.normal(ks[1], (Ci, Ci, KSIZE, KSIZE), jnp.float32) * 0.1,
        'w3': jax.random.normal(ks[2], (C, Ci, 1, 1), jnp.float32) * 0.1,
        'bn1': bn_params(ks[3], Ci),
        'bn2': bn_params(ks[4], Ci),
        'bn3': bn_params(ks[5], C),
    }


if __name__ == "__main__":
    B, C, H, W = 2, 16, 16, 16
    INTERNAL_RATIO = 4
    Ci = C // INTERNAL_RATIO

    key = jax.random.PRNGKey(0)
    kx, kp = jax.random.split(key)
    x = jax.random.normal(kx, (B, C, H, W), jnp.float32)
    params = make_params(kp, C, Ci)

    out = jax.block_until_ready(regular_bottleneck_pallas(x, params))
    ref = jax.block_until_ready(regular_bottleneck_ref(x, params))

    np.testing.assert_allclose(np.asarray(out), np.asarray(ref),
                               rtol=1e-3, atol=1e-3)
    print("KERNEL_OK")
</pallas_src>

<mosaic_0001>
module attributes {stable_mosaic.version = 11 : i64} {
  func.func @_bottleneck_kernel(%arg0: memref<32x256xf32, #tpu.memory_space<vmem>>, %arg1: memref<3x32x32xf32, #tpu.memory_space<vmem>>, %arg2: memref<3x256x64xf32, #tpu.memory_space<vmem>>, %arg3: memref<1x64xf32, #tpu.memory_space<vmem>>, %arg4: memref<3x64x64xf32, #tpu.memory_space<vmem>>, %arg5: memref<1x64xf32, #tpu.memory_space<vmem>>, %arg6: memref<64x256xf32, #tpu.memory_space<vmem>>, %arg7: memref<1x256xf32, #tpu.memory_space<vmem>>, %arg8: memref<32x256xf32, #tpu.memory_space<vmem>>) attributes {dimension_semantics = [], scalar_prefetch = 0 : i64, scratch_operands = 0 : i64, tpu.core_type = #tpu.core_type<tc>} {
    %c0 = arith.constant 0 : index
    %c0_0 = arith.constant 0 : index
    %0 = vector.load %arg0[%c0, %c0_0] : memref<32x256xf32, #tpu.memory_space<vmem>>, vector<32x256xf32>
    %c0_1 = arith.constant 0 : index
    %c0_2 = arith.constant 0 : index
    %c0_3 = arith.constant 0 : index
    %1 = vector.load %arg1[%c0_1, %c0_2, %c0_3] : memref<3x32x32xf32, #tpu.memory_space<vmem>>, vector<1x32x32xf32>
    %2 = vector.shape_cast %1 : vector<1x32x32xf32> to vector<32x32xf32>
    %cst = arith.constant dense<0.000000e+00> : vector<32x256xf32>
    %3 = tpu.matmul %2, %0, %cst {dimension_numbers = #tpu.dot_dimension_numbers<[1], [0], [0], [1], [0, 0, 1, 1], [], []>} : vector<32x32xf32>, vector<32x256xf32>, vector<32x256xf32> -> vector<32x256xf32>
    %c0_4 = arith.constant 0 : index
    %c0_5 = arith.constant 0 : index
    %c0_6 = arith.constant 0 : index
    %4 = vector.load %arg2[%c0_4, %c0_5, %c0_6] : memref<3x256x64xf32, #tpu.memory_space<vmem>>, vector<1x256x64xf32>
    %5 = vector.shape_cast %4 : vector<1x256x64xf32> to vector<256x64xf32>
    %cst_7 = arith.constant dense<0.000000e+00> : vector<32x64xf32>
    %6 = tpu.matmul %3, %5, %cst_7 {dimension_numbers = #tpu.dot_dimension_numbers<[1], [0], [0], [1], [0, 0, 1, 1], [], []>} : vector<32x256xf32>, vector<256x64xf32>, vector<32x64xf32> -> vector<32x64xf32>
    %c1 = arith.constant 1 : index
    %c0_8 = arith.constant 0 : index
    %c0_9 = arith.constant 0 : index
    %7 = vector.load %arg1[%c1, %c0_8, %c0_9] : memref<3x32x32xf32, #tpu.memory_space<vmem>>, vector<1x32x32xf32>
    %8 = vector.shape_cast %7 : vector<1x32x32xf32> to vector<32x32xf32>
    %cst_10 = arith.constant dense<0.000000e+00> : vector<32x256xf32>
    %9 = tpu.matmul %8, %0, %cst_10 {dimension_numbers = #tpu.dot_dimension_numbers<[1], [0], [0], [1], [0, 0, 1, 1], [], []>} : vector<32x32xf32>, vector<32x256xf32>, vector<32x256xf32> -> vector<32x256xf32>
    %c1_11 = arith.constant 1 : index
    %c0_12 = arith.constant 0 : index
    %c0_13 = arith.constant 0 : index
    %10 = vector.load %arg2[%c1_11, %c0_12, %c0_13] : memref<3x256x64xf32, #tpu.memory_space<vmem>>, vector<1x256x64xf32>
    %11 = vector.shape_cast %10 : vector<1x256x64xf32> to vector<256x64xf32>
    %cst_14 = arith.constant dense<0.000000e+00> : vector<32x64xf32>
    %12 = tpu.matmul %9, %11, %cst_14 {dimension_numbers = #tpu.dot_dimension_numbers<[1], [0], [0], [1], [0, 0, 1, 1], [], []>} : vector<32x256xf32>, vector<256x64xf32>, vector<32x64xf32> -> vector<32x64xf32>
    %13 = arith.addf %6, %12 : vector<32x64xf32>
    %c2 = arith.constant 2 : index
    %c0_15 = arith.constant 0 : index
    %c0_16 = arith.constant 0 : index
    %14 = vector.load %arg1[%c2, %c0_15, %c0_16] : memref<3x32x32xf32, #tpu.memory_space<vmem>>, vector<1x32x32xf32>
    %15 = vector.shape_cast %14 : vector<1x32x32xf32> to vector<32x32xf32>
    %cst_17 = arith.constant dense<0.000000e+00> : vector<32x256xf32>
    %16 = tpu.matmul %15, %0, %cst_17 {dimension_numbers = #tpu.dot_dimension_numbers<[1], [0], [0], [1], [0, 0, 1, 1], [], []>} : vector<32x32xf32>, vector<32x256xf32>, vector<32x256xf32> -> vector<32x256xf32>
    %c2_18 = arith.constant 2 : index
    %c0_19 = arith.constant 0 : index
    %c0_20 = arith.constant 0 : index
    %17 = vector.load %arg2[%c2_18, %c0_19, %c0_20] : memref<3x256x64xf32, #tpu.memory_space<vmem>>, vector<1x256x64xf32>
    %18 = vector.shape_cast %17 : vector<1x256x64xf32> to vector<256x64xf32>
    %cst_21 = arith.constant dense<0.000000e+00> : vector<32x64xf32>
    %19 = tpu.matmul %16, %18, %cst_21 {dimension_numbers = #tpu.dot_dimension_numbers<[1], [0], [0], [1], [0, 0, 1, 1], [], []>} : vector<32x256xf32>, vector<256x64xf32>, vector<32x64xf32> -> vector<32x64xf32>
    %20 = arith.addf %13, %19 : vector<32x64xf32>
    %c0_22 = arith.constant 0 : index
    %c0_23 = arith.constant 0 : index
    %21 = vector.load %arg3[%c0_22, %c0_23] : memref<1x64xf32, #tpu.memory_space<vmem>>, vector<1x64xf32>
    %22 = vector.broadcast %21 : vector<1x64xf32> to vector<32x64xf32>
    %23 = arith.addf %20, %22 : vector<32x64xf32>
    %cst_24 = arith.constant 0.000000e+00 : f32
    %24 = vector.broadcast %cst_24 : f32 to vector<32x64xf32>
    %25 = arith.maximumf %23, %24 : vector<32x64xf32>
    %c0_25 = arith.constant 0 : index
    %c0_26 = arith.constant 0 : index
    %c0_27 = arith.constant 0 : index
    %26 = vector.load %arg1[%c0_25, %c0_26, %c0_27] : memref<3x32x32xf32, #tpu.memory_space<vmem>>, vector<1x32x32xf32>
    %27 = vector.shape_cast %26 : vector<1x32x32xf32> to vector<32x32xf32>
    %cst_28 = arith.constant dense<0.000000e+00> : vector<32x64xf32>
    %28 = tpu.matmul %27, %25, %cst_28 {dimension_numbers = #tpu.dot_dimension_numbers<[1], [0], [0], [1], [0, 0, 1, 1], [], []>} : vector<32x32xf32>, vector<32x64xf32>, vector<32x64xf32> -> vector<32x64xf32>
    %c0_29 = arith.constant 0 : index
    %c0_30 = arith.constant 0 : index
    %c0_31 = arith.constant 0 : index
    %29 = vector.load %arg4[%c0_29, %c0_30, %c0_31] : memref<3x64x64xf32, #tpu.memory_space<vmem>>, vector<1x64x64xf32>
    %30 = vector.shape_cast %29 : vector<1x64x64xf32> to vector<64x64xf32>
    %cst_32 = arith.constant dense<0.000000e+00> : vector<32x64xf32>
    %31 = tpu.matmul %28, %30, %cst_32 {dimension_numbers = #tpu.dot_dimension_numbers<[1], [0], [0], [1], [0, 0, 1, 1], [], []>} : vector<32x64xf32>, vector<64x64xf32>, vector<32x64xf32> -> vector<32x64xf32>
    %c1_33 = arith.constant 1 : index
    %c0_34 = arith.constant 0 : index
    %c0_35 = arith.constant 0 : index
    %32 = vector.load %arg1[%c1_33, %c0_34, %c0_35] : memref<3x32x32xf32, #tpu.memory_space<vmem>>, vector<1x32x32xf32>
    %33 = vector.shape_cast %32 : vector<1x32x32xf32> to vector<32x32xf32>
    %cst_36 = arith.constant dense<0.000000e+00> : vector<32x64xf32>
    %34 = tpu.matmul %33, %25, %cst_36 {dimension_numbers = #tpu.dot_dimension_numbers<[1], [0], [0], [1], [0, 0, 1, 1], [], []>} : vector<32x32xf32>, vector<32x64xf32>, vector<32x64xf32> -> vector<32x64xf32>
    %c1_37 = arith.constant 1 : index
    %c0_38 = arith.constant 0 : index
    %c0_39 = arith.constant 0 : index
    %35 = vector.load %arg4[%c1_37, %c0_38, %c0_39] : memref<3x64x64xf32, #tpu.memory_space<vmem>>, vector<1x64x64xf32>
    %36 = vector.shape_cast %35 : vector<1x64x64xf32> to vector<64x64xf32>
    %cst_40 = arith.constant dense<0.000000e+00> : vector<32x64xf32>
    %37 = tpu.matmul %34, %36, %cst_40 {dimension_numbers = #tpu.dot_dimension_numbers<[1], [0], [0], [1], [0, 0, 1, 1], [], []>} : vector<32x64xf32>, vector<64x64xf32>, vector<32x64xf32> -> vector<32x64xf32>
    %38 = arith.addf %31, %37 : vector<32x64xf32>
    %c2_41 = arith.constant 2 : index
    %c0_42 = arith.constant 0 : index
    %c0_43 = arith.constant 0 : index
    %39 = vector.load %arg1[%c2_41, %c0_42, %c0_43] : memref<3x32x32xf32, #tpu.memory_space<vmem>>, vector<1x32x32xf32>
    %40 = vector.shape_cast %39 : vector<1x32x32xf32> to vector<32x32xf32>
    %cst_44 = arith.constant dense<0.000000e+00> : vector<32x64xf32>
    %41 = tpu.matmul %40, %25, %cst_44 {dimension_numbers = #tpu.dot_dimension_numbers<[1], [0], [0], [1], [0, 0, 1, 1], [], []>} : vector<32x32xf32>, vector<32x64xf32>, vector<32x64xf32> -> vector<32x64xf32>
    %c2_45 = arith.constant 2 : index
    %c0_46 = arith.constant 0 : index
    %c0_47 = arith.constant 0 : index
    %42 = vector.load %arg4[%c2_45, %c0_46, %c0_47] : memref<3x64x64xf32, #tpu.memory_space<vmem>>, vector<1x64x64xf32>
    %43 = vector.shape_cast %42 : vector<1x64x64xf32> to vector<64x64xf32>
    %cst_48 = arith.constant dense<0.000000e+00> : vector<32x64xf32>
    %44 = tpu.matmul %41, %43, %cst_48 {dimension_numbers = #tpu.dot_dimension_numbers<[1], [0], [0], [1], [0, 0, 1, 1], [], []>} : vector<32x64xf32>, vector<64x64xf32>, vector<32x64xf32> -> vector<32x64xf32>
    %45 = arith.addf %38, %44 : vector<32x64xf32>
    %c0_49 = arith.constant 0 : index
    %c0_50 = arith.constant 0 : index
    %46 = vector.load %arg5[%c0_49, %c0_50] : memref<1x64xf32, #tpu.memory_space<vmem>>, vector<1x64xf32>
    %47 = vector.broadcast %46 : vector<1x64xf32> to vector<32x64xf32>
    %48 = arith.addf %45, %47 : vector<32x64xf32>
    %cst_51 = arith.constant 0.000000e+00 : f32
    %49 = vector.broadcast %cst_51 : f32 to vector<32x64xf32>
    %50 = arith.maximumf %48, %49 : vector<32x64xf32>
    %c0_52 = arith.constant 0 : index
    %c0_53 = arith.constant 0 : index
    %51 = vector.load %arg6[%c0_52, %c0_53] : memref<64x256xf32, #tpu.memory_space<vmem>>, vector<64x256xf32>
    %cst_54 = arith.constant dense<0.000000e+00> : vector<32x256xf32>
    %52 = tpu.matmul %50, %51, %cst_54 {dimension_numbers = #tpu.dot_dimension_numbers<[1], [0], [0], [1], [0, 0, 1, 1], [], []>} : vector<32x64xf32>, vector<64x256xf32>, vector<32x256xf32> -> vector<32x256xf32>
    %c0_55 = arith.constant 0 : index
    %c0_56 = arith.constant 0 : index
    %53 = vector.load %arg7[%c0_55, %c0_56] : memref<1x256xf32, #tpu.memory_space<vmem>>, vector<1x256xf32>
    %54 = vector.broadcast %53 : vector<1x256xf32> to vector<32x256xf32>
    %55 = arith.addf %52, %54 : vector<32x256xf32>
    %cst_57 = arith.constant 0.000000e+00 : f32
    %56 = vector.broadcast %cst_57 : f32 to vector<32x256xf32>
    %57 = arith.maximumf %55, %56 : vector<32x256xf32>
    %58 = arith.addf %0, %57 : vector<32x256xf32>
    %c0_58 = arith.constant 0 : index
    %c0_59 = arith.constant 0 : index
    %59 = vector.load %arg8[%c0_58, %c0_59] : memref<32x256xf32, #tpu.memory_space<vmem>>, vector<32x256xf32>
    tpu.vector_store %arg8[%c0_58, %c0_59], %58 {strides = array<i32>} : memref<32x256xf32, #tpu.memory_space<vmem>>, vector<32x256xf32>,
    return
  }
}

</mosaic_0001>

<bundles_post_ra>
// kernel: tpu_custom_call.1
= control target key start
LH: loop header
LB: loop body
LE: loop exit
PB: predicated region body
PF: predicated region fallthrough
CT: control target
= control target key end

     0   :  { %v2171_v7 = vmov 0.0   ;;  %vm42_vm0 = vcmask 261120   ;;  %s2857_s0 = inlined_call_operand.vmem [shape: f32[32,256], index: 0, kind: input, shape index: {}]   ;;  %s2858_s1 = inlined_call_operand.vmem [shape: f32[3,32,32], index: 1, kind: input, shape index: {}]   ;;  %s2859_s2 = inlined_call_operand.vmem [shape: f32[3,256,64], index: 2, kind: input, shape index: {}]   ;;  %s2860_s3 = inlined_call_operand.vmem [shape: f32[1,64], index: 3, kind: input, shape index: {}]   ;;  %s2861_s4 = inlined_call_operand.vmem [shape: f32[3,64,64], index: 4, kind: input, shape index: {}]   ;;  %s2862_s5 = inlined_call_operand.vmem [shape: f32[1,64], index: 5, kind: input, shape index: {}]   ;;  %s2863_s6 = inlined_call_operand.vmem [shape: f32[64,256], index: 6, kind: input, shape index: {}]   ;;  %s2864_s7 = inlined_call_operand.vmem [shape: f32[1,256], index: 7, kind: input, shape index: {}]   ;;  %s2865_s8 = inlined_call_operand.hbm [shape: f32[32,256], index: 8, kind: output, shape index: {}]  }
   0x1   :  { %v31_v0 = vld [vmem:[%s2857_s0 + $0x8] sm:$0xff]  ;;  %v33_v1 = vld [vmem:[%s2857_s0 + $0x18] sm:$0xff]  ;;  %v30_v2 = vld [vmem:[%s2857_s0] sm:$0xff]  ;;  %119 = vmatprep.mubr.f32.mxu0 %v2171_v7  ;;  %257 = vmatprep.mubr.f32.mxu1 %v2171_v7 }
   0x2   :  { %v2229_v3 = vpack.c.bf16 %v33_v1, %v31_v0  ;;  %v32_v4 = vld [vmem:[%s2857_s0 + $0x10] sm:$0xff]  ;;  %v35_v5 = vld [vmem:[%s2857_s0 + $0x28] sm:$0xff]  ;;  %v37_v6 = vld [vmem:[%s2857_s0 + $0x38] sm:$0xff] }
   0x3   :  { %v2242_v8 = vpack.c.bf16 %v32_v4, %v30_v2  ;;  %v2244_v9 = vpack.c.bf16 %v37_v6, %v35_v5  ;;  %v34_v10 = vld [vmem:[%s2857_s0 + $0x20] sm:$0xff]  ;;  %v36_v11 = vld [vmem:[%s2857_s0 + $0x30] sm:$0xff]  ;;  %v1518_v14 = vld [vmem:[%s2859_s2 + $0x188] sm:$0xff] }
   0x4   :  { %1920 = vmatprep.subr.bf16.mxu0 %v2229_v3  ;;  %1928 = vmatprep.subr.bf16.mxu1 %v2229_v3  ;;  %v2256_v12 = vpack.c.bf16 %v36_v11, %v34_v10  ;;  %v1517_v13 = vld [vmem:[%s2859_s2 + $0x180] sm:$0xff]  ;;  %v161_v19 = vld [vmem:[%s2859_s2 + $0x88] sm:$0xff]  ;;  %v1519_v25 = vld [vmem:[%s2859_s2 + $0x190] sm:$0xff] }
   0x5   :  { %1922 = vmatpush1.bf16.msra.mxu0 %v2242_v8  ;;  %1930 = vmatpush1.bf16.msra.mxu1 %v2242_v8  ;;  %v2269_v15 = vld [vmem:[%s2858_s1] sm:$0xff]  ;;  %v1935_v17 = vpack.c.bf16 %v1518_v14, %v1517_v13  ;;  %v1502_v22 = vld [vmem:[%s2859_s2 + $0x108] sm:$0xff]  ;;  %v1520_v26 = vld [vmem:[%s2859_s2 + $0x198] sm:$0xff] }
   0x6   :  { %1924 = vmatprep.subr.bf16.mxu0 %v2244_v9  ;;  %1932 = vmatprep.subr.bf16.mxu1 %v2244_v9  ;;  %v2274_v16 = vld [vmem:[%s2858_s1 + $0x20] sm:$0xff]  ;;  %v145_v24 = vld [vmem:[%s2859_s2 + $0x8] sm:$0xff]  ;;  %v162_v27 = vld [vmem:[%s2859_s2 + $0x90] sm:$0xff]  ;;  %v1939_v33 = vpack.c.bf16 %v1520_v26, %v1519_v25 }
   0x7   :  { %v160_v18 = vld [vmem:[%s2859_s2 + $0x80] sm:$0xff]  ;;  %v163_v30 = vld [vmem:[%s2859_s2 + $0x98] sm:$0xff]  ;;  %v1503_v31 = vld [vmem:[%s2859_s2 + $0x110] sm:$0xff] }
   0x8   :  { %v1501_v20 = vld [vmem:[%s2859_s2 + $0x100] sm:$0xff]  ;;  %v1967_v21 = vpack.c.bf16 %v161_v19, %v160_v18  ;;  %v1504_v32 = vld [vmem:[%s2859_s2 + $0x118] sm:$0xff]  ;;  %v1971_v34 = vpack.c.bf16 %v163_v30, %v162_v27  ;;  %v146_v35 = vld [vmem:[%s2859_s2 + $0x10] sm:$0xff] }
   0x9   :  { %v144_v23 = vld [vmem:[%s2859_s2] sm:$0xff]  ;;  %1926 = vmatpush1.bf16.msra.mxu0 %v2256_v12  ;;  %1934 = vmatpush1.bf16.msra.mxu1 %v2256_v12  ;;  %v1937_v28 = vpack.c.bf16 %v1502_v22, %v1501_v20  ;;  %v147_v36 = vld [vmem:[%s2859_s2 + $0x18] sm:$0xff]  ;;  %v1522_v38 = vld [vmem:[%s2859_s2 + $0x1a8] sm:$0xff]  ;;  %v1941_v43 = vpack.c.bf16 %v1504_v32, %v1503_v31 }
   0xa   :  { %1936 = vmatprep.subr.bf16.mxu0 %v1935_v17  ;;  %1968 = vmatprep.subr.bf16.mxu1 %v1967_v21  ;;  %v1969_v29 = vpack.c.bf16 %v145_v24, %v144_v23  ;;  %v1521_v37 = vld [vmem:[%s2859_s2 + $0x1a0] sm:$0xff]  ;;  %v165_v40 = vld [vmem:[%s2859_s2 + $0xa8] sm:$0xff]  ;;  %v1973_v44 = vpack.c.bf16 %v147_v36, %v146_v35  ;;  %v1523_v51 = vld [vmem:[%s2859_s2 + $0x1b0] sm:$0xff] }
   0xb   :  { %v164_v39 = vld [vmem:[%s2859_s2 + $0xa0] sm:$0xff]  ;;  %v2341_v41 = vld [vmem:[%s2858_s1 + $0x8] sm:$0xff]  ;;  %v1943_v47 = vpack.c.bf16 %v1522_v38, %v1521_v37  ;;  %v1524_v52 = vld [vmem:[%s2859_s2 + $0x1b8] sm:$0xff] }
   0xc   :  { %1489 = vmatmul.mubr.msk.f32.vlgmr.msra.gmra.mrb[0].mxu0 %vm42_vm0, %v2269_v15  ;;  %1497 = vmatmul.mubr.msk.f32.vlgmr.msra.gmra.mrb[0].mxu1 %vm42_vm0, %v2274_v16  ;;  %v2346_v42 = vld [vmem:[%s2858_s1 + $0x28] sm:$0xff]  ;;  %v1505_v45 = vld [vmem:[%s2859_s2 + $0x120] sm:$0xff]  ;;  %v1975_v48 = vpack.c.bf16 %v165_v40, %v164_v39  ;;  %v166_v53 = vld [vmem:[%s2859_s2 + $0xb0] sm:$0xff]  ;;  %v1947_v61 = vpack.c.bf16 %v1524_v52, %v1523_v51 }
   0xd   :  { %125 = vmatprep.mubr.f32.mxu0 %v2171_v7  ;;  %263 = vmatprep.mubr.f32.mxu1 %v2171_v7  ;;  %v1506_v46 = vld [vmem:[%s2859_s2 + $0x128] sm:$0xff]  ;;  %v148_v49 = vld [vmem:[%s2859_s2 + $0x20] sm:$0xff]  ;;  %v167_v54 = vld [vmem:[%s2859_s2 + $0xb8] sm:$0xff] }
   0xe   :  { %1938 = vmatpush3.bf16.msra.mxu0 %v1937_v28  ;;  %1970 = vmatpush3.bf16.msra.mxu1 %v1969_v29  ;;  %v149_v50 = vld [vmem:[%s2859_s2 + $0x28] sm:$0xff]  ;;  %v2381_v55 = vld [vmem:[%s2858_s1 + $0x10] sm:$0xff]  ;;  %v1945_v57 = vpack.c.bf16 %v1506_v46, %v1505_v45  ;;  %v1508_v60 = vld [vmem:[%s2859_s2 + $0x138] sm:$0xff]  ;;  %v1979_v62 = vpack.c.bf16 %v167_v54, %v166_v53 }
   0xf   :  { %1940 = vmatprep.subr.bf16.mxu0 %v1939_v33  ;;  %1972 = vmatprep.subr.bf16.mxu1 %v1971_v34  ;;  %v2386_v56 = vld [vmem:[%s2858_s1 + $0x30] sm:$0xff]  ;;  %v1977_v58 = vpack.c.bf16 %v149_v50, %v148_v49  ;;  %v151_v0 = vld [vmem:[%s2859_s2 + $0x38] sm:$0xff]  ;;  %v1525_v1 = vld [vmem:[%s2859_s2 + $0x1c0] sm:$0xff] }
  0x10   :  { %1490 = vmatmul.mubr.msk.f32.gmra.mrb[2].mxu0 %vm42_vm0, %v2341_v41  ;;  %1498 = vmatmul.mubr.msk.f32.gmra.mrb[2].mxu1 %vm42_vm0, %v2346_v42  ;;  %v1507_v59 = vld [vmem:[%s2859_s2 + $0x130] sm:$0xff]  ;;  %v1526_v2 = vld [vmem:[%s2859_s2 + $0x1c8] sm:$0xff]  ;;  %v168_v4 = vld [vmem:[%s2859_s2 + $0xc0] sm:$0xff] }
  0x11   :  { %131 = vmatprep.mubr.f32.mxu0 %v2171_v7  ;;  %269 = vmatprep.mubr.f32.mxu1 %v2171_v7  ;;  %v150_v63 = vld [vmem:[%s2859_s2 + $0x30] sm:$0xff]  ;;  %v169_v5 = vld [vmem:[%s2859_s2 + $0xc8] sm:$0xff]  ;;  %v2421_v6 = vld [vmem:[%s2858_s1 + $0x18] sm:$0xff]  ;;  %v1949_v11 = vpack.c.bf16 %v1508_v60, %v1507_v59  ;;  %v1951_v18 = vpack.c.bf16 %v1526_v2, %v1525_v1 }
  0x12   :  { %1942 = vmatpush3.bf16.msra.mxu0 %v1941_v43  ;;  %1974 = vmatpush3.bf16.msra.mxu1 %v1973_v44  ;;  %v2426_v10 = vld [vmem:[%s2858_s1 + $0x38] sm:$0xff]  ;;  %v1981_v13 = vpack.c.bf16 %v151_v0, %v150_v63  ;;  %v1509_v14 = vld [vmem:[%s2859_s2 + $0x140] sm:$0xff]  ;;  %v1510_v17 = vld [vmem:[%s2859_s2 + $0x148] sm:$0xff]  ;;  %v1983_v19 = vpack.c.bf16 %v169_v5, %v168_v4 }
  0x13   :  { %1944 = vmatprep.subr.bf16.mxu0 %v1943_v47  ;;  %1976 = vmatprep.subr.bf16.mxu1 %v1975_v48  ;;  %v152_v20 = vld [vmem:[%s2859_s2 + $0x40] sm:$0xff]  ;;  %v153_v21 = vld [vmem:[%s2859_s2 + $0x48] sm:$0xff]  ;;  %v1527_v22 = vld [vmem:[%s2859_s2 + $0x1d0] sm:$0xff]  ;;  %v1953_v26 = vpack.c.bf16 %v1510_v17, %v1509_v14 }
  0x14   :  { %1491 = vmatmul.mubr.msk.f32.gmra.mrb[4].mxu0 %vm42_vm0, %v2381_v55  ;;  %1499 = vmatmul.mubr.msk.f32.gmra.mrb[4].mxu1 %vm42_vm0, %v2386_v56  ;;  %v1528_v23 = vld [vmem:[%s2859_s2 + $0x1d8] sm:$0xff]  ;;  %v170_v24 = vld [vmem:[%s2859_s2 + $0xd0] sm:$0xff]  ;;  %v1985_v27 = vpack.c.bf16 %v153_v21, %v152_v20 }
  0x15   :  { %137 = vmatprep.mubr.f32.mxu0 %v2171_v7  ;;  %275 = vmatprep.mubr.f32.mxu1 %v2171_v7  ;;  %v171_v25 = vld [vmem:[%s2859_s2 + $0xd8] sm:$0xff]  ;;  %v1511_v28 = vld [vmem:[%s2859_s2 + $0x150] sm:$0xff] }
  0x16   :  { %1946 = vmatpush3.bf16.msra.mxu0 %v1945_v57  ;;  %1978 = vmatpush3.bf16.msra.mxu1 %v1977_v58  ;;  %v1512_v29 = vld [vmem:[%s2859_s2 + $0x158] sm:$0xff] }
  0x17   :  { %1948 = vmatprep.subr.bf16.mxu0 %v1947_v61  ;;  %1980 = vmatprep.subr.bf16.mxu1 %v1979_v62 }
  0x18   :  { %1492 = vmatmul.mubr.msk.f32.gmra.mrb[6].mxu0 %vm42_vm0, %v2421_v6  ;;  %1500 = vmatmul.mubr.msk.f32.gmra.mrb[6].mxu1 %vm42_vm0, %v2426_v10 }
  0x1a   :  { %1950 = vmatpush3.bf16.msra.mxu0 %v1949_v11  ;;  %1982 = vmatpush3.bf16.msra.mxu1 %v1981_v13 }
  0x1b   :  { %13 = vsyncpa [#allocation3], 0  ;;  %1952 = vmatprep.subr.bf16.mxu0 %v1951_v18  ;;  %1984 = vmatprep.subr.bf16.mxu1 %v1983_v19  ;;  %v1955_v30 = vpack.c.bf16 %v1528_v23, %v1527_v22  ;;  %v1987_v31 = vpack.c.bf16 %v171_v25, %v170_v24  ;;  %v154_v32 = vld [vmem:[%s2859_s2 + $0x50] sm:$0xff]  ;;  %v155_v33 = vld [vmem:[%s2859_s2 + $0x58] sm:$0xff]  ;;  %v1957_v38 = vpack.c.bf16 %v1512_v29, %v1511_v28  ;;  %vm915_vm1 = vcmask 523264   ;;  %s2172_s9 = smov [#allocation2]  }
  0x1c   :  { %v1529_v34 = vld [vmem:[%s2859_s2 + $0x1e0] sm:$0xff]  ;;  %v1530_v35 = vld [vmem:[%s2859_s2 + $0x1e8] sm:$0xff]  ;;  %v1989_v39 = vpack.c.bf16 %v155_v33, %v154_v32  ;;  %v1531_v48 = vld [vmem:[%s2859_s2 + $0x1f0] sm:$0xff]  ;;  %s1478_s10 = sshll.u32 %s2172_s9, 4  ;;  %s1479_s10 = int_to_ptr.vmem [resolvable:$true] %s1478_s10 }
  0x1d   :  { %v172_v36 = vld [vmem:[%s2859_s2 + $0xe0] sm:$0xff]  ;;  %v173_v37 = vld [vmem:[%s2859_s2 + $0xe8] sm:$0xff]  ;;  %v1959_v44 = vpack.c.bf16 %v1530_v35, %v1529_v34  ;;  %v1532_v49 = vld [vmem:[%s2859_s2 + $0x1f8] sm:$0xff]  ;;  %p2152_p1 = scmp.lt.s32.totalorder %s1479_s10, %s1479_s10 }
  0x1e   :  { %1954 = vmatpush3.bf16.msra.mxu0 %v1953_v26  ;;  %1986 = vmatpush3.bf16.msra.mxu1 %v1985_v27  ;;  %v1513_v40 = vld [vmem:[%s2859_s2 + $0x160] sm:$0xff]  ;;  %v1514_v43 = vld [vmem:[%s2859_s2 + $0x168] sm:$0xff]  ;;  %v1991_v45 = vpack.c.bf16 %v173_v37, %v172_v36  ;;  %v174_v50 = vld [vmem:[%s2859_s2 + $0xf0] sm:$0xff]  ;;  %v1963_v54 = vpack.c.bf16 %v1532_v49, %v1531_v48 }
  0x1f   :  { %1956 = vmatprep.subr.bf16.mxu0 %v1955_v30  ;;  %1988 = vmatprep.subr.bf16.mxu1 %v1987_v31  ;;  %v156_v46 = vld [vmem:[%s2859_s2 + $0x60] sm:$0xff]  ;;  %v157_v47 = vld [vmem:[%s2859_s2 + $0x68] sm:$0xff]  ;;  %v175_v51 = vld [vmem:[%s2859_s2 + $0xf8] sm:$0xff]  ;;  %v1961_v52 = vpack.c.bf16 %v1514_v43, %v1513_v40 }
  0x20   :  { %v1993_v53 = vpack.c.bf16 %v157_v47, %v156_v46  ;;  %v1995_v57 = vpack.c.bf16 %v175_v51, %v174_v50  ;;  %v1515_v58 = vld [vmem:[%s2859_s2 + $0x170] sm:$0xff]  ;;  %v1516_v59 = vld [vmem:[%s2859_s2 + $0x178] sm:$0xff]  ;;  %v1557_v0 = vld [vmem:[%s2859_s2 + $0x280] sm:$0xff] }
  0x21   :  { %v158_v60 = vld [vmem:[%s2859_s2 + $0x70] sm:$0xff]  ;;  %v1965_v61 = vpack.c.bf16 %v1516_v59, %v1515_v58  ;;  %v159_v62 = vld [vmem:[%s2859_s2 + $0x78] sm:$0xff]  ;;  %v1558_v1 = vld [vmem:[%s2859_s2 + $0x288] sm:$0xff] }
  0x22   :  { %1958 = vmatpush3.bf16.msra.mxu0 %v1957_v38  ;;  %1990 = vmatpush3.bf16.msra.mxu1 %v1989_v39  ;;  %v1997_v63 = vpack.c.bf16 %v159_v62, %v158_v60  ;;  %v2007_v2 = vpack.c.bf16 %v1558_v1, %v1557_v0  ;;  %v1541_v4 = vld [vmem:[%s2859_s2 + $0x200] sm:$0xff]  ;;  %v1542_v5 = vld [vmem:[%s2859_s2 + $0x208] sm:$0xff]  ;;  %v1560_v11 = vld [vmem:[%s2859_s2 + $0x298] sm:$0xff] }
  0x23   :  { %1960 = vmatprep.subr.bf16.mxu0 %v1959_v44  ;;  %1992 = vmatprep.subr.bf16.mxu1 %v1991_v45  ;;  %v2009_v17 = vpack.c.bf16 %v1542_v5, %v1541_v4  ;;  %v1543_v21 = vld [vmem:[%s2859_s2 + $0x210] sm:$0xff]  ;;  %v1544_v22 = vld [vmem:[%s2859_s2 + $0x218] sm:$0xff]  ;;  %v1561_v23 = vld [vmem:[%s2859_s2 + $0x2a0] sm:$0xff] }
  0x24   :  { %v1562_v24 = vld [vmem:[%s2859_s2 + $0x2a8] sm:$0xff]  ;;  %v2013_v27 = vpack.c.bf16 %v1544_v22, %v1543_v21  ;;  %v1545_v31 = vld [vmem:[%s2859_s2 + $0x220] sm:$0xff]  ;;  %v2582_v46 = vld [vmem:[%s2858_s1 + $0x50] sm:$0xff] }
  0x25   :  { %v2015_v30 = vpack.c.bf16 %v1562_v24, %v1561_v23  ;;  %v1546_v32 = vld [vmem:[%s2859_s2 + $0x228] sm:$0xff]  ;;  %v2590_v47 = vld [vmem:[%s2858_s1 + $0x58] sm:$0xff]  ;;  %v1547_v48 = vld [vmem:[%s2859_s2 + $0x230] sm:$0xff] }
  0x26   :  { %1962 = vmatpush3.bf16.msra.mxu0 %v1961_v52  ;;  %1994 = vmatpush3.bf16.msra.mxu1 %v1993_v53  ;;  %v2017_v35 = vpack.c.bf16 %v1546_v32, %v1545_v31  ;;  %v2574_v45 = vld [vmem:[%s2858_s1 + $0x48] sm:$0xff]  ;;  %v1548_v49 = vld [vmem:[%s2859_s2 + $0x238] sm:$0xff]  ;;  %v1565_v51 = vld [vmem:[%s2859_s2 + $0x2c0] sm:$0xff] }
  0x27   :  { %1964 = vmatprep.subr.bf16.mxu0 %v1963_v54  ;;  %1996 = vmatprep.subr.bf16.mxu1 %v1995_v57  ;;  %v2021_v50 = vpack.c.bf16 %v1548_v49, %v1547_v48  ;;  %v1566_v52 = vld [vmem:[%s2859_s2 + $0x2c8] sm:$0xff]  ;;  %v1567_v58 = vld [vmem:[%s2859_s2 + $0x2d0] sm:$0xff]  ;;  %v1568_v59 = vld [vmem:[%s2859_s2 + $0x2d8] sm:$0xff] }
  0x28   :  { %v2023_v53 = vpack.c.bf16 %v1566_v52, %v1565_v51  ;;  %v1550_v54 = vld [vmem:[%s2859_s2 + $0x248] sm:$0xff]  ;;  %v2027_v60 = vpack.c.bf16 %v1568_v59, %v1567_v58  ;;  %v1552_v62 = vld [vmem:[%s2859_s2 + $0x258] sm:$0xff]  ;;  %v1569_v0 = vld [vmem:[%s2859_s2 + $0x2e0] sm:$0xff] }
  0x29   :  { %v1570_v1 = vld [vmem:[%s2859_s2 + $0x2e8] sm:$0xff]  ;;  %v1553_v4 = vld [vmem:[%s2859_s2 + $0x260] sm:$0xff] }
  0x2a   :  { %1966 = vmatpush3.bf16.msra.mxu0 %v1965_v61  ;;  %1998 = vmatpush3.bf16.msra.mxu1 %v1997_v63  ;;  %v1551_v61 = vld [vmem:[%s2859_s2 + $0x250] sm:$0xff]  ;;  %v1554_v5 = vld [vmem:[%s2859_s2 + $0x268] sm:$0xff] }
  0x2b   :  { %2000 = vmatprep.subr.bf16.mxu0 %v2229_v3  ;;  %2008 = vmatprep.subr.bf16.mxu1 %v2007_v2  ;;  %v1559_v3 = vld [vmem:[%s2859_s2 + $0x290] sm:$0xff]  ;;  %v2029_v63 = vpack.c.bf16 %v1552_v62, %v1551_v61  ;;  %v2031_v2 = vpack.c.bf16 %v1570_v1, %v1569_v0  ;;  %v1583_v61 = vld [vmem:[%s2861_s4 + $0x48] sm:$0xff]  ;;  %v1585_v0 = vld [vmem:[%s2861_s4 + $0x58] sm:$0xff] }
  0x2c   :  { %v2011_v20 = vpack.c.bf16 %v1560_v11, %v1559_v3  ;;  %v2033_v3 = vpack.c.bf16 %v1554_v5, %v1553_v4  ;;  %v1571_v11 = vld [vmem:[%s2859_s2 + $0x2f0] sm:$0xff]  ;;  %v1587_v4 = vld [vmem:[%s2861_s4 + $0x68] sm:$0xff] }
  0x2d   :  { %v1584_v62 = vld [vmem:[%s2861_s4 + $0x50] sm:$0xff] }
  0x2e   :  { %v2059_v1 = vpack.c.bf16 %v1585_v0, %v1584_v62  ;;  %v816_v62 = vld [vmem:[%s2861_s4 + $0x18] sm:$0xff] }
  0xdf   :  { %v121_v13 = vpop.f32.mrb[0].mxu0  ;;  %v259_v14 = vpop.f32.mrb[0].mxu1 }
  0xe0   :  { %v123_v18 = vpop.f32.mrb[1].mxu0  ;;  %v261_v19 = vpop.f32.mrb[1].mxu1 }
  0xe1   :  { %379 = vmatprep.mubr.f32.mxu0 %v261_v19  ;;  %464 = vmatprep.mubr.f32.mxu1 %v123_v18  ;;  %v1556_v18 = vld [vmem:[%s2859_s2 + $0x278] sm:$0xff] }
  0xe2   :  { %380 = vmatmul.mubr.f32.vlgmr.msra.gmra.mrb[8].mxu0 %v259_v14  ;;  %465 = vmatmul.mubr.f32.vlgmr.msra.gmra.mrb[8].mxu1 %v121_v13  ;;  %v1572_v13 = vld [vmem:[%s2859_s2 + $0x2f8] sm:$0xff] }
  0xe3   :  { %v127_v25 = vpop.f32.mrb[2].mxu0  ;;  %v265_v26 = vpop.f32.mrb[2].mxu1  ;;  %2002 = vmatpush1.bf16.msra.mxu0 %v2242_v8  ;;  %2010 = vmatpush3.bf16.msra.mxu1 %v2009_v17  ;;  %v1563_v8 = vld [vmem:[%s2859_s2 + $0x2b0] sm:$0xff]  ;;  %v2035_v14 = vpack.c.bf16 %v1572_v13, %v1571_v11 }
  0xe4   :  { %v129_v28 = vpop.f32.mrb[3].mxu0  ;;  %v267_v29 = vpop.f32.mrb[3].mxu1  ;;  %2004 = vmatprep.subr.bf16.mxu0 %v2244_v9  ;;  %2012 = vmatprep.subr.bf16.mxu1 %v2011_v20  ;;  %v1564_v9 = vld [vmem:[%s2859_s2 + $0x2b8] sm:$0xff]  ;;  %v1555_v17 = vld [vmem:[%s2859_s2 + $0x270] sm:$0xff] }
  0xe5   :  { %384 = vmatprep.mubr.f32.mxu0 %v267_v29  ;;  %469 = vmatprep.mubr.f32.mxu1 %v129_v28  ;;  %v2019_v38 = vpack.c.bf16 %v1564_v9, %v1563_v8  ;;  %v2037_v19 = vpack.c.bf16 %v1556_v18, %v1555_v17  ;;  %v1573_v18 = vld [vmem:[%s2860_s3] ss:$0 sm:$0xff] }
  0xe6   :  { %385 = vmatmul.mubr.f32.gmra.mrb[10].mxu0 %v265_v26  ;;  %470 = vmatmul.mubr.f32.gmra.mrb[10].mxu1 %v127_v25 }
  0xe7   :  { %v133_v33 = vpop.f32.mrb[4].mxu0  ;;  %v271_v34 = vpop.f32.mrb[4].mxu1  ;;  %2006 = vmatpush1.bf16.msra.mxu0 %v2256_v12  ;;  %2014 = vmatpush3.bf16.msra.mxu1 %v2013_v27  ;;  %v2566_v12 = vld [vmem:[%s2858_s1 + $0x40] sm:$0xff] }
  0xe8   :  { %v135_v36 = vpop.f32.mrb[5].mxu0  ;;  %v273_v37 = vpop.f32.mrb[5].mxu1  ;;  %2016 = vmatprep.subr.bf16.mxu1 %v2015_v30 }
  0xe9   :  { %389 = vmatprep.mubr.f32.mxu0 %v273_v37  ;;  %474 = vmatprep.mubr.f32.mxu1 %v135_v36 }
  0xea   :  { %390 = vmatmul.mubr.f32.gmra.mrb[12].mxu0 %v271_v34  ;;  %475 = vmatmul.mubr.f32.gmra.mrb[12].mxu1 %v133_v33 }
  0xeb   :  { %v139_v39 = vpop.f32.mrb[6].mxu0  ;;  %v277_v40 = vpop.f32.mrb[6].mxu1  ;;  %2018 = vmatpush3.bf16.msra.mxu1 %v2017_v35 }
  0xec   :  { %v141_v43 = vpop.f32.mrb[7].mxu0  ;;  %v279_v44 = vpop.f32.mrb[7].mxu1  ;;  %2020 = vmatprep.subr.bf16.mxu1 %v2019_v38 }
  0xed   :  { %394 = vmatprep.mubr.f32.mxu0 %v279_v44  ;;  %479 = vmatprep.mubr.f32.mxu1 %v141_v43 }
  0xee   :  { %395 = vmatmul.mubr.f32.gmra.mrb[14].mxu0 %v277_v40  ;;  %480 = vmatmul.mubr.f32.gmra.mrb[14].mxu1 %v139_v39 }
  0xef   :  { %566 = vmatprep.mubr.f32.mxu0 %v2171_v7  ;;  %2022 = vmatpush3.bf16.msra.mxu1 %v2021_v50 }
  0xf0   :  { %2024 = vmatprep.subr.bf16.mxu1 %v2023_v53 }
  0xf2   :  { %1537 = vmatmul.mubr.msk.f32.vlgmr.msra.gmra.mrb[16].mxu0 %vm42_vm0, %v2566_v12 }
  0xf3   :  { %572 = vmatprep.mubr.f32.mxu0 %v2171_v7 }
  0xf6   :  { %1538 = vmatmul.mubr.msk.f32.gmra.mrb[18].mxu0 %vm42_vm0, %v2574_v45 }
  0xf7   :  { %578 = vmatprep.mubr.f32.mxu0 %v2171_v7 }
  0xfa   :  { %1539 = vmatmul.mubr.msk.f32.gmra.mrb[20].mxu0 %vm42_vm0, %v2582_v46 }
  0xfb   :  { %584 = vmatprep.mubr.f32.mxu0 %v2171_v7 }
  0xfe   :  { %1540 = vmatmul.mubr.msk.f32.gmra.mrb[22].mxu0 %vm42_vm0, %v2590_v47 }
  0xff   :  { %1819 = vmatprep.mubr.msk.f32.mxu0 %vm42_vm0, %v2269_v15  ;;  %v1549_v15 = vld [vmem:[%s2859_s2 + $0x240] sm:$0xff]  ;;  %s2147_s2 = scalar_lea.vmem %s1479_s10, 1024 }
 0x100   :  { %v2025_v57 = vpack.c.bf16 %v1550_v54, %v1549_v15  ;;  %p2148_p0 = scmp.ne.s32.totalorder %s1479_s10, %s2147_s2  ;;  %p2153_p2 = scmp.lt.s32.totalorder %s2147_s2, %s2147_s2 }
 0x102   :  { %2026 = vmatpush3.bf16.msra.mxu1 %v2025_v57  ;;  %p2154_p3 = por %p2153_p2, %p2152_p1 }
 0x103   :  { %2028 = vmatprep.subr.bf16.mxu1 %v2027_v60  ;;  %v1582_v60 = vld [vmem:[%s2861_s4 + $0x40] sm:$0xff] }
 0x104   :  { %p2155_p4 = pnand %p2154_p3, %p2148_p0 }
 0x106   :  { %2030 = vmatpush3.bf16.msra.mxu1 %v2029_v63  ;;  %v2055_v63 = vpack.c.bf16 %v1583_v61, %v1582_v60  ;;  %v815_v61 = vld [vmem:[%s2861_s4 + $0x10] sm:$0xff] }
 0x107   :  { %2032 = vmatprep.subr.bf16.mxu1 %v2031_v2  ;;  %v1586_v2 = vld [vmem:[%s2861_s4 + $0x60] sm:$0xff] }
 0x108   :  { %v2063_v5 = vpack.c.bf16 %v1587_v4, %v1586_v2  ;;  %v817_v2 = vld [vmem:[%s2861_s4 + $0x20] sm:$0xff]  ;;  %v818_v4 = vld [vmem:[%s2861_s4 + $0x28] sm:$0xff] }
 0x10a   :  { %2034 = vmatpush3.bf16.msra.mxu1 %v2033_v3 }
 0x10b   :  { %2036 = vmatprep.subr.bf16.mxu1 %v2035_v14 }
 0x10e   :  { %2038 = vmatpush3.bf16.msra.mxu1 %v2037_v19 }
 0x10f   :  { %2056 = vmatprep.subr.bf16.mxu1 %v2055_v63 }
 0x1b5   :  { %v1651_v20 = vpop.f32.mrb[8].mxu0  ;;  %v1695_v21 = vpop.f32.mrb[8].mxu1 }
 0x1b6   :  { %v1652_v22 = vpop.f32.mrb[9].mxu0  ;;  %v1696_v23 = vpop.f32.mrb[9].mxu1 }
 0x1b7   :  { %v1653_v24 = vadd.f32 %v1652_v22, %v1651_v20  ;;  %v1697_v25 = vadd.f32 %v1696_v23, %v1695_v21 }
 0x1b9   :  { %v467_v26 = vadd.f32 %v1697_v25, %v1653_v24  ;;  %v1654_v27 = vpop.f32.mrb[10].mxu0  ;;  %v1698_v28 = vpop.f32.mrb[10].mxu1 }
 0x1ba   :  { %v1655_v29 = vpop.f32.mrb[11].mxu0  ;;  %v1699_v30 = vpop.f32.mrb[11].mxu1 }
 0x1bb   :  { %v1656_v31 = vadd.f32 %v1655_v29, %v1654_v27  ;;  %v1700_v32 = vadd.f32 %v1699_v30, %v1698_v28 }
 0x1bd   :  { %v472_v8 = vadd.f32 %v1700_v32, %v1656_v31  ;;  %v1657_v9 = vpop.f32.mrb[12].mxu0  ;;  %v1701_v33 = vpop.f32.mrb[12].mxu1 }
 0x1be   :  { %v1658_v34 = vpop.f32.mrb[13].mxu0  ;;  %v1702_v35 = vpop.f32.mrb[13].mxu1 }
 0x1bf   :  { %v1659_v36 = vadd.f32 %v1658_v34, %v1657_v9  ;;  %v1703_v37 = vadd.f32 %v1702_v35, %v1701_v33 }
 0x1c1   :  { %v477_v38 = vadd.f32 %v1703_v37, %v1659_v36  ;;  %v1660_v39 = vpop.f32.mrb[14].mxu0  ;;  %v1704_v40 = vpop.f32.mrb[14].mxu1 }
 0x1c2   :  { %v1661_v43 = vpop.f32.mrb[15].mxu0  ;;  %v1705_v44 = vpop.f32.mrb[15].mxu1 }
 0x1c3   :  { %v1662_v48 = vadd.f32 %v1661_v43, %v1660_v39  ;;  %v1706_v49 = vadd.f32 %v1705_v44, %v1704_v40  ;;  %v1324_v44 = vld [vmem:[%s2863_s6 + $0x20] sm:$0xff] }
 0x1c5   :  { %v482_v50 = vadd.f32 %v1706_v49, %v1662_v48  ;;  %v568_v51 = vpop.f32.mrb[16].mxu0  ;;  %v1326_v48 = vld [vmem:[%s2863_s6 + $0x30] sm:$0xff]  ;;  %v1329_v49 = vld [vmem:[%s2863_s6 + $0x48] sm:$0xff] }
 0x1c6   :  { %v570_v52 = vpop.f32.mrb[17].mxu0 }
 0x1c7   :  { %688 = vmatprep.mubr.f32.mxu1 %v570_v52 }
 0x1c8   :  { %689 = vmatmul.mubr.f32.vlgmr.msra.gmra.mrb[16].mxu1 %v568_v51  ;;  %v2117_v51 = vpack.c.bf16 %v1326_v48, %v1324_v44  ;;  %v1336_v48 = vld [vmem:[%s2864_s7] sm:$0x3] }
 0x1c9   :  { %v574_v53 = vpop.f32.mrb[18].mxu0  ;;  %2058 = vmatpush3.bf16.msra.mxu1 %v2055_v63 }
 0x1ca   :  { %v576_v15 = vpop.f32.mrb[19].mxu0  ;;  %2060 = vmatprep.subr.bf16.mxu1 %v2059_v1 }
 0x1cb   :  { %693 = vmatprep.mubr.f32.mxu1 %v576_v15  ;;  %v1330_v15 = vld [vmem:[%s2863_s6 + $0x50] sm:$0xff] }
 0x1cc   :  { %694 = vmatmul.mubr.f32.gmra.mrb[18].mxu1 %v574_v53  ;;  %v1328_v53 = vld [vmem:[%s2863_s6 + $0x40] sm:$0xff] }
 0x1cd   :  { %v580_v54 = vpop.f32.mrb[20].mxu0  ;;  %2062 = vmatpush3.bf16.msra.mxu1 %v2059_v1  ;;  %v2075_v1 = vpack.c.bf16 %v816_v62, %v815_v61 }
 0x1ce   :  { %v582_v57 = vpop.f32.mrb[21].mxu0  ;;  %2064 = vmatprep.subr.bf16.mxu1 %v2063_v5 }
 0x1cf   :  { %698 = vmatprep.mubr.f32.mxu1 %v582_v57 }
 0x1d0   :  { %699 = vmatmul.mubr.f32.gmra.mrb[20].mxu1 %v580_v54  ;;  %v2121_v54 = vpack.c.bf16 %v1330_v15, %v1328_v53 }
 0x1d1   :  { %v586_v58 = vpop.f32.mrb[22].mxu0  ;;  %2066 = vmatpush3.bf16.msra.mxu1 %v2063_v5 }
 0x1d2   :  { %v588_v59 = vpop.f32.mrb[23].mxu0 }
 0x1d3   :  { %703 = vmatprep.mubr.f32.mxu1 %v588_v59 }
 0x1d4   :  { %704 = vmatmul.mubr.f32.gmra.mrb[22].mxu1 %v586_v58 }
 0x29b   :  { %v1739_v3 = vpop.f32.mrb[16].mxu1 }
 0x29c   :  { %v1740_v11 = vpop.f32.mrb[17].mxu1 }
 0x29d   :  { %v1741_v13 = vadd.f32 %v1740_v11, %v1739_v3  ;;  %v2079_v11 = vpack.c.bf16 %v818_v4, %v817_v2 }
 0x29f   :  { %v709_v14 = vadd.f32 %v1741_v13, %v467_v26  ;;  %v1742_v17 = vpop.f32.mrb[18].mxu1  ;;  %v819_v13 = vld [vmem:[%s2861_s4 + $0x30] sm:$0xff] }
 0x2a0   :  { %v1743_v19 = vpop.f32.mrb[19].mxu1 }
 0x2a1   :  { %v1744_v20 = vadd.f32 %v1743_v19, %v1742_v17  ;;  %v720_v21 = vadd.f32 %v1573_v18, %v709_v14  ;;  %v820_v14 = vld [vmem:[%s2861_s4 + $0x38] sm:$0xff] }
 0x2a3   :  { %v710_v22 = vadd.f32 %v1744_v20, %v472_v8  ;;  %v1745_v23 = vpop.f32.mrb[20].mxu1  ;;  %v724_v28 = vmax.f32 %v720_v21, 0.0  ;;  %v1325_v8 = vld [vmem:[%s2863_s6 + $0x28] sm:$0xff]  ;;  %v1602_v20 = vld [vmem:[%s2861_s4 + $0x80] sm:$0xff] }
 0x2a4   :  { %v1746_v24 = vpop.f32.mrb[21].mxu1  ;;  %v1603_v21 = vld [vmem:[%s2861_s4 + $0x88] sm:$0xff] }
 0x2a5   :  { %v721_v25 = vadd.f32 %v1573_v18, %v710_v22  ;;  %v1747_v27 = vadd.f32 %v1746_v24, %v1745_v23  ;;  %v2095_v23 = vpack.c.bf16 %v1603_v21, %v1602_v20 }
 0x2a7   :  { %v725_v29 = vmax.f32 %v721_v25, 0.0  ;;  %v711_v30 = vadd.f32 %v1747_v27, %v477_v38  ;;  %v1748_v31 = vpop.f32.mrb[22].mxu1  ;;  %v1327_v38 = vld [vmem:[%s2863_s6 + $0x38] sm:$0xff]  ;;  %v1604_v25 = vld [vmem:[%s2861_s4 + $0x90] sm:$0xff] }
 0x2a8   :  { %v1749_v32 = vpop.f32.mrb[23].mxu1  ;;  %v2115_v43 = vpack.c.bf16 %v1327_v38, %v1325_v8  ;;  %v1605_v27 = vld [vmem:[%s2861_s4 + $0x98] sm:$0xff] }
 0x2a9   :  { %v2039_v9 = vpack.c.bf16 %v725_v29, %v724_v28  ;;  %v1750_v26 = vadd.f32 %v1749_v32, %v1748_v31  ;;  %v722_v33 = vadd.f32 %v1573_v18, %v711_v30  ;;  %v2099_v28 = vpack.c.bf16 %v1605_v27, %v1604_v25  ;;  %v1606_v29 = vld [vmem:[%s2861_s4 + $0xa0] sm:$0xff]  ;;  %v1607_v30 = vld [vmem:[%s2861_s4 + $0xa8] sm:$0xff]  ;;  %v1608_v32 = vld [vmem:[%s2861_s4 + $0xb0] sm:$0xff] }
 0x2aa   :  { %v2103_v31 = vpack.c.bf16 %v1607_v30, %v1606_v29 }
 0x2ab   :  { %v712_v34 = vadd.f32 %v1750_v26, %v482_v50  ;;  %2040 = vmatprep.subr.bf16.mxu0 %v2039_v9  ;;  %v726_v36 = vmax.f32 %v722_v33, 0.0  ;;  %v1331_v50 = vld [vmem:[%s2863_s6 + $0x58] sm:$0xff]  ;;  %v1333_v33 = vld [vmem:[%s2863_s6 + $0x68] sm:$0xff] }
 0x2ac   :  { %2042 = vmatpush3.bf16.msra.mxu0 %v2039_v9  ;;  %v2119_v52 = vpack.c.bf16 %v1331_v50, %v1329_v49 }
 0x2ad   :  { %v723_v35 = vadd.f32 %v1573_v18, %v712_v34  ;;  %v2083_v18 = vpack.c.bf16 %v820_v14, %v819_v13  ;;  %v1335_v34 = vld [vmem:[%s2863_s6 + $0x78] sm:$0xff] }
 0x2af   :  { %v727_v37 = vmax.f32 %v723_v35, 0.0  ;;  %v2123_v35 = vpack.c.bf16 %v1335_v34, %v1333_v33  ;;  %v2146_v33 = vld [vmem:[%s2857_s0 + $0x38] sm:$0xff] }
 0x2b1   :  { %v2043_v39 = vpack.c.bf16 %v727_v37, %v726_v36  ;;  %v1332_v36 = vld [vmem:[%s2863_s6 + $0x60] sm:$0xff]  ;;  %v1334_v37 = vld [vmem:[%s2863_s6 + $0x70] sm:$0xff] }
 0x2b3   :  { %2044 = vmatprep.subr.bf16.mxu0 %v2043_v39 }
 0x2b4   :  { %2046 = vmatpush3.bf16.msra.mxu0 %v2043_v39 }
 0x2b5   :  { %2048 = vmatprep.subr.bf16.mxu0 %v2039_v9 }
 0x2b7   :  { %1820 = vmatmul.mubr.msk.f32.vlgmr.msra.gmra.mrb[24].mxu0 %vm42_vm0, %v2341_v41  ;;  %v1589_v41 = vld [vmem:[%s2861_s4 + $0x78] sm:$0xff] }
 0x2b8   :  { %2050 = vmatpush3.bf16.msra.mxu0 %v2039_v9  ;;  %1822 = vmatprep.mubr.msk.f32.mxu0 %vm42_vm0, %v2381_v55  ;;  %v813_v55 = vld [vmem:[%s2861_s4] sm:$0xff] }
 0x2b9   :  { %2052 = vmatprep.subr.bf16.mxu0 %v2043_v39 }
 0x2bb   :  { %1823 = vmatmul.mubr.msk.f32.gmra.mrb[26].mxu0 %vm42_vm0, %v2421_v6 }
 0x2bc   :  { %2054 = vmatpush3.bf16.msra.mxu0 %v2043_v39  ;;  %1833 = vmatprep.mubr.msk.f32.mxu0 %vm42_vm0, %v2274_v16  ;;  %v1588_v16 = vld [vmem:[%s2861_s4 + $0x70] sm:$0xff] }
 0x2bd   :  { %2088 = vmatprep.subr.bf16.mxu0 %v2039_v9 }
 0x2bf   :  { %1834 = vmatmul.mubr.msk.f32.vlgmr.msra.gmra.mrb[28].mxu0 %vm42_vm0, %v2346_v42  ;;  %v2067_v42 = vpack.c.bf16 %v1589_v41, %v1588_v16  ;;  %v1614_v16 = vld [vmem:[%s2862_s5] ss:$0 sm:$0xff] }
 0x2c0   :  { %2090 = vmatpush3.bf16.msra.mxu0 %v2039_v9  ;;  %1836 = vmatprep.mubr.msk.f32.mxu0 %vm42_vm0, %v2386_v56  ;;  %v814_v56 = vld [vmem:[%s2861_s4 + $0x8] sm:$0xff]  ;;  %v1609_v9 = vld [vmem:[%s2861_s4 + $0xb8] sm:$0xff] }
 0x2c1   :  { %2092 = vmatprep.subr.bf16.mxu0 %v2043_v39  ;;  %2068 = vmatprep.subr.bf16.mxu1 %v2067_v42  ;;  %v2071_v6 = vpack.c.bf16 %v814_v56, %v813_v55  ;;  %v2107_v26 = vpack.c.bf16 %v1609_v9, %v1608_v32  ;;  %v2145_v9 = vld [vmem:[%s2857_s0 + $0x30] sm:$0xff] }
 0x2c2   :  { %2070 = vmatpush3.bf16.msra.mxu1 %v2067_v42 }
 0x2c3   :  { %1837 = vmatmul.mubr.msk.f32.gmra.mrb[30].mxu0 %vm42_vm0, %v2426_v10  ;;  %2072 = vmatprep.subr.bf16.mxu1 %v2071_v6  ;;  %v1321_v10 = vld [vmem:[%s2863_s6 + $0x8] sm:$0xff] }
 0x2c4   :  { %2094 = vmatpush3.bf16.msra.mxu0 %v2043_v39  ;;  %1891 = vmatprep.mubr.msk.f32.mxu0 %vm42_vm0, %v2566_v12  ;;  %v1323_v12 = vld [vmem:[%s2863_s6 + $0x18] sm:$0xff]  ;;  %v2125_v39 = vpack.c.bf16 %v1334_v37, %v1332_v36 }
 0x2c7   :  { %1892 = vmatmul.mubr.msk.f32.vlgmr.msra.gmra.mrb[32].mxu0 %vm42_vm0, %v2574_v45  ;;  %v1320_v45 = vld [vmem:[%s2863_s6] sm:$0xff] }
 0x2c8   :  { %1894 = vmatprep.mubr.msk.f32.mxu0 %vm42_vm0, %v2582_v46  ;;  %v2111_v46 = vpack.c.bf16 %v1323_v12, %v1321_v10 }
 0x2ca   :  { %2112 = vmatprep.subr.bf16.mxu0 %v2111_v46 }
 0x2cb   :  { %1895 = vmatmul.mubr.msk.f32.gmra.mrb[34].mxu0 %vm42_vm0, %v2590_v47  ;;  %v1322_v47 = vld [vmem:[%s2863_s6 + $0x10] sm:$0xff] }
 0x2cc   :  { %1424 = vmatprep.mubr.f32.mxu0 %v2171_v7  ;;  %v2113_v40 = vpack.c.bf16 %v1322_v47, %v1320_v45 }
 0x2ce   :  { %2114 = vmatpush1.bf16.msra.mxu0 %v2113_v40  ;;  %v1338_v40 = vlaneseq }
 0x2cf   :  { %2116 = vmatprep.subr.bf16.mxu0 %v2115_v43 }
 0x2d0   :  { %v1339_v43 = vshrl.u32 %v1338_v40, 7 }
 0x2d2   :  { %2118 = vmatpush1.bf16.msra.mxu0 %v2117_v51  ;;  %v1340_v44 = vsub.s32 0, %v1339_v43  ;;  %v1344_v49 = vsub.s32 1, %v1339_v43 }
 0x2d3   :  { %2120 = vmatprep.subr.bf16.mxu0 %v2119_v52 }
 0x2d4   :  { %v1341_v50 = vrot.slane %v1336_v48, %v1340_v44  ;;  %v1345_v51 = vrot.slane %v1336_v48, %v1344_v49 }
 0x2d6   :  { %2122 = vmatpush1.bf16.msra.mxu0 %v2121_v54 }
 0x2d7   :  { %2124 = vmatprep.subr.bf16.mxu0 %v2123_v35 }
 0x2da   :  { %2126 = vmatpush1.bf16.msra.mxu0 %v2125_v39 }
 0x38a   :  { %v1821_v57 = vpop.f32.mrb[24].mxu0 }
 0x38b   :  { %v794_v58 = vpop.f32.mrb[25].mxu0 }
 0x38e   :  { %v1824_v59 = vpop.f32.mrb[26].mxu0 }
 0x38f   :  { %v804_v60 = vpop.f32.mrb[27].mxu0 }
 0x392   :  { %v1835_v63 = vpop.f32.mrb[28].mxu0 }
 0x393   :  { %v887_v0 = vpop.f32.mrb[29].mxu0 }
 0x394   :  { %1855 = vmatprep.mubr.msk.f32.mxu1 %vm915_vm1, %v887_v0 }
 0x395   :  { %1856 = vmatmul.mubr.msk.f32.vlgmr.msra.gmra.mrb[24].mxu1 %vm915_vm1, %v1835_v63  ;;  %v2140_v63 = vld [vmem:[%s2857_s0 + $0x8] sm:$0xff] }
 0x396   :  { %2074 = vmatpush3.bf16.msra.mxu1 %v2071_v6  ;;  %v1838_v5 = vpop.f32.mrb[30].mxu0 }
 0x397   :  { %v897_v3 = vpop.f32.mrb[31].mxu0  ;;  %2076 = vmatprep.subr.bf16.mxu1 %v2075_v1 }
 0x398   :  { %1858 = vmatprep.mubr.msk.f32.mxu1 %vm915_vm1, %v897_v3  ;;  %v2141_v3 = vld [vmem:[%s2857_s0 + $0x10] sm:$0xff] }
 0x399   :  { %1859 = vmatmul.mubr.msk.f32.gmra.mrb[26].mxu1 %vm915_vm1, %v1838_v5 }
 0x39a   :  { %2078 = vmatpush3.bf16.msra.mxu1 %v2075_v1  ;;  %1877 = vmatprep.mubr.msk.f32.mxu1 %vm915_vm1, %v794_v58  ;;  %v1893_v17 = vpop.f32.mrb[32].mxu0 }
 0x39b   :  { %2080 = vmatprep.subr.bf16.mxu1 %v2079_v11  ;;  %v1176_v19 = vpop.f32.mrb[33].mxu0 }
 0x39e   :  { %2082 = vmatpush3.bf16.msra.mxu1 %v2079_v11  ;;  %v1896_v22 = vpop.f32.mrb[34].mxu0 }
 0x39f   :  { %2084 = vmatprep.subr.bf16.mxu1 %v2083_v18  ;;  %v1186_v24 = vpop.f32.mrb[35].mxu0 }
 0x3a2   :  { %2086 = vmatpush3.bf16.msra.mxu1 %v2083_v18 }
 0x3a3   :  { %2096 = vmatprep.subr.bf16.mxu1 %v2095_v23 }
 0x3a5   :  { %1878 = vmatmul.mubr.msk.f32.vlgmr.msra.gmra.mrb[24].mxu1 %vm915_vm1, %v1821_v57 }
 0x3a6   :  { %1880 = vmatprep.mubr.msk.f32.mxu1 %vm915_vm1, %v804_v60  ;;  %2098 = vmatpush3.bf16.msra.mxu1 %v2095_v23  ;;  %v2143_v23 = vld [vmem:[%s2857_s0 + $0x20] sm:$0xff] }
 0x3a7   :  { %2100 = vmatprep.subr.bf16.mxu1 %v2099_v28 }
 0x3a9   :  { %1881 = vmatmul.mubr.msk.f32.gmra.mrb[26].mxu1 %vm915_vm1, %v1824_v59  ;;  %v2139_v59 = vld [vmem:[%s2857_s0] sm:$0xff] }
 0x3aa   :  { %2102 = vmatpush3.bf16.msra.mxu1 %v2099_v28  ;;  %1913 = vmatprep.mubr.msk.f32.mxu1 %vm915_vm1, %v1176_v19  ;;  %v2144_v28 = vld [vmem:[%s2857_s0 + $0x28] sm:$0xff] }
 0x3ab   :  { %2104 = vmatprep.subr.bf16.mxu1 %v2103_v31 }
 0x3ae   :  { %2106 = vmatpush3.bf16.msra.mxu1 %v2103_v31 }
 0x3af   :  { %2108 = vmatprep.subr.bf16.mxu1 %v2107_v26 }
 0x3b2   :  { %2110 = vmatpush3.bf16.msra.mxu1 %v2107_v26 }
 0x3b5   :  { %1914 = vmatmul.mubr.msk.f32.vlgmr.msra.gmra.mrb[24].mxu1 %vm915_vm1, %v1893_v17  ;;  %v2142_v17 = vld [vmem:[%s2857_s0 + $0x18] sm:$0xff] }
 0x3b6   :  { %1916 = vmatprep.mubr.msk.f32.mxu1 %vm915_vm1, %v1186_v24 }
 0x3b9   :  { %1917 = vmatmul.mubr.msk.f32.gmra.mrb[26].mxu1 %vm915_vm1, %v1896_v22 }
 0x488   :  { %v1915_v41 = vpop.f32.mrb[24].mxu1 }
 0x489   :  { %v1282_v42 = vpop.f32.mrb[25].mxu1  ;;  %v1313_v56 = vadd.f32 %v1915_v41, %v1614_v16 }
 0x48a   :  { %v1312_v55 = vadd.f32 %v1614_v16, %v1282_v42 }
 0x48b   :  { %v1317_v45 = vmax.f32 %v1313_v56, 0.0 }
 0x48c   :  { %v1316_v6 = vmax.f32 %v1312_v55, 0.0  ;;  %v1918_v10 = vpop.f32.mrb[26].mxu1 }
 0x48d   :  { %v1292_v12 = vpop.f32.mrb[27].mxu1  ;;  %v1315_v47 = vadd.f32 %v1918_v10, %v1614_v16 }
 0x48e   :  { %1615 = vmatmul.mubr.msk.f32.vlgmr.msra.gmra.mrb[36].mxu0 %vm915_vm1, %v1316_v6  ;;  %v1314_v46 = vadd.f32 %v1614_v16, %v1292_v12 }
 0x48f   :  { %1430 = vmatprep.mubr.f32.mxu0 %v2171_v7  ;;  %v1319_v38 = vmax.f32 %v1315_v47, 0.0 }
 0x490   :  { %v1318_v8 = vmax.f32 %v1314_v46, 0.0 }
 0x492   :  { %1616 = vmatmul.mubr.msk.f32.gmra.mrb[38].mxu0 %vm915_vm1, %v1317_v45 }
 0x493   :  { %1436 = vmatprep.mubr.f32.mxu0 %v2171_v7 }
 0x496   :  { %1617 = vmatmul.mubr.msk.f32.gmra.mrb[40].mxu0 %vm915_vm1, %v1318_v8 }
 0x497   :  { %1442 = vmatprep.mubr.f32.mxu0 %v2171_v7 }
 0x49a   :  { %1618 = vmatmul.mubr.msk.f32.gmra.mrb[42].mxu0 %vm915_vm1, %v1319_v38 }
 0x561   :  { %v1426_v52 = vpop.f32.mrb[36].mxu0 }
 0x562   :  { %v1427_v53 = vadd.f32 %v1426_v52, %v1341_v50  ;;  %v1428_v15 = vpop.f32.mrb[37].mxu0 }
 0x563   :  { %v1429_v54 = vadd.f32 %v1428_v15, %v1345_v51 }
 0x564   :  { %v1449_v57 = vmax.f32 %v1427_v53, 0.0 }
 0x565   :  { %v1450_v58 = vmax.f32 %v1429_v54, 0.0  ;;  %v1432_v7 = vpop.f32.mrb[38].mxu0 }
 0x566   :  { %v1457_v60 = vadd.f32 %v2139_v59, %v1449_v57  ;;  %v1433_v61 = vadd.f32 %v1432_v7, %v1341_v50  ;;  %v1434_v62 = vpop.f32.mrb[39].mxu0 }
 0x567   :  { %v1458_v0 = vadd.f32 %v2140_v63, %v1450_v58  ;;  %v1435_v1 = vadd.f32 %v1434_v62, %v1345_v51 }
 0x568   :  { %1465 = vst [vmem:[#allocation2] sm:$0xff] %v1457_v60  ;;  %v1451_v2 = vmax.f32 %v1433_v61, 0.0 }
 0x569   :  { %1466 = vst [vmem:[#allocation2 + $0x8] sm:$0xff] %v1458_v0  ;;  %v1452_v4 = vmax.f32 %v1435_v1, 0.0  ;;  %v1438_v5 = vpop.f32.mrb[40].mxu0 }
 0x56a   :  { %v1459_v11 = vadd.f32 %v2141_v3, %v1451_v2  ;;  %v1439_v13 = vadd.f32 %v1438_v5, %v1341_v50  ;;  %v1440_v14 = vpop.f32.mrb[41].mxu0 }
 0x56b   :  { %v1460_v18 = vadd.f32 %v2142_v17, %v1452_v4  ;;  %v1441_v19 = vadd.f32 %v1440_v14, %v1345_v51 }
 0x56c   :  { %1467 = vst [vmem:[#allocation2 + $0x10] sm:$0xff] %v1459_v11  ;;  %v1453_v20 = vmax.f32 %v1439_v13, 0.0 }
 0x56d   :  { %1468 = vst [vmem:[#allocation2 + $0x18] sm:$0xff] %v1460_v18  ;;  %v1454_v21 = vmax.f32 %v1441_v19, 0.0  ;;  %v1444_v22 = vpop.f32.mrb[42].mxu0 }
 0x56e   :  { %v1461_v24 = vadd.f32 %v2143_v23, %v1453_v20  ;;  %v1445_v25 = vadd.f32 %v1444_v22, %v1341_v50  ;;  %v1446_v27 = vpop.f32.mrb[43].mxu0 }
 0x56f   :  { %v1462_v29 = vadd.f32 %v2144_v28, %v1454_v21  ;;  %v1447_v30 = vadd.f32 %v1446_v27, %v1345_v51 }
 0x570   :  { %1469 = vst [vmem:[#allocation2 + $0x20] sm:$0xff] %v1461_v24  ;;  %v1455_v31 = vmax.f32 %v1445_v25, 0.0 }
 0x571   :  { %1470 = vst [vmem:[#allocation2 + $0x28] sm:$0xff] %v1462_v29  ;;  %v1456_v32 = vmax.f32 %v1447_v30, 0.0 }
 0x572   :  { %v1463_v26 = vadd.f32 %v2145_v9, %v1455_v31 }
 0x573   :  { %v1464_v34 = vadd.f32 %v2146_v33, %v1456_v32 }
 0x574   :  { %1471 = vst [vmem:[#allocation2 + $0x30] sm:$0xff] %v1463_v26 }
 0x575   :  { %1472 = vst [vmem:[#allocation2 + $0x38] sm:$0xff] %v1464_v34 }
 0x576   :  { %2158 = shalt.err (!%p2155_p4)
}
 0x577   :  { %s2159_s16 = scalar_lea.hbm %s2865_s8, 1024 }
 0x578   :  { %p2160_p5 = scmp.ne.s32.totalorder %s2865_s8, %s2159_s16  ;;  %p2163_p6 = scmp.lt.u32.totalorder %s2159_s16, %s2865_s8 }
 0x57a   :  { %p2165_p7 = pnand %p2163_p6, %p2160_p5 }
 0x57c   :  { %2168 = shalt.err (!%p2165_p7)
}
 0x57d   :  { %s2173_s20 = smov 256   ;;  %s2174_s21 = smov 16  }
 0x57e   :  { %1484 = dma.vmem_to_hbm [thread:$0]  %s1479_s10, 1024, %s2865_s8, [#allocation3], %s2173_s20, %s2173_s20, %s2174_s21  }
 0x57f   :  { %2169 = dma.done.wait [#allocation3], 1024  }
 0x580   :  { %2170 = vsyncadd [#allocation3], 4294966272 }
 0x581   :  { %1488 = vsyncpa [#allocation3], 1 }

</bundles_post_ra>
